<compile_context>
chip_gen: v5e
topology: v5e:2x2
jax: 0.10.0
libtpu: 0.0.40
codegen_flags: <defaults>
</compile_context>

<pallas_src>
import functools

import jax
import jax.numpy as jnp
from jax.experimental import pallas as pl
from jax.experimental.pallas import tpu as pltpu


def ensemble_mlp_kernel(s_ref, a_ref, g_ref,
                        w1s_ref, w1a_ref, w1g_ref, b1_ref,
                        w2_ref, b2_ref, w3_ref, b3_ref, out_ref):
    # Layer 1: fused across the ensemble; the concat is folded into three
    # matmuls against row-slices of W1 (no (B, Din) intermediate).
    h1 = (jnp.dot(s_ref[...], w1s_ref[...], preferred_element_type=jnp.float32)
          + jnp.dot(a_ref[...], w1a_ref[...], preferred_element_type=jnp.float32)
          + jnp.dot(g_ref[...], w1g_ref[...], preferred_element_type=jnp.float32)
          + b1_ref[...])
    h1 = jnp.maximum(h1, 0.0)

    # Layer 2: one block-diagonal matmul for all critics (lane-dense).
    h2 = jnp.dot(h1.astype(w2_ref.dtype), w2_ref[...],
                 preferred_element_type=jnp.float32) + b2_ref[...]
    h2 = jnp.maximum(h2, 0.0)

    # Layer 3: block-diagonal (n_Q*H2, n_Q) -> lane-dense (tm, n_Q) output,
    # written with a single full store.
    q = jnp.dot(h2.astype(w3_ref.dtype), w3_ref[...],
                preferred_element_type=jnp.float32) + b3_ref[...]
    out_ref[...] = q.astype(out_ref.dtype)


def ensemble_critic_forward(state, action, goal, params, *,
                            block_batch=256, compute_dtype=jnp.float32):
    """Forward pass matching torch EnsembleCritic: returns (B, n_Q)."""
    W1, b1, W2, b2, W3, b3 = params
    n_Q, Din, H1 = W1.shape
    H2 = W2.shape[2]
    sd, ad, gd = state.shape[-1], action.shape[-1], goal.shape[-1]
    assert sd + ad + gd == Din, "W1 input dim must equal state+action+goal dims"

    # Activations / weights in compute_dtype (f32 default; bf16 halves HBM
    # traffic on v6e/v7x); biases stay f32 (added to the f32 accumulator).
    state = state.astype(compute_dtype)
    action = action.astype(compute_dtype)
    goal = goal.astype(compute_dtype)

    # Layer 1 fused across the ensemble: columns ordered (q, h) -> q*H1 + h.
    W1_all = jnp.transpose(W1, (1, 0, 2)).reshape(Din, n_Q * H1).astype(compute_dtype)
    W1s, W1a, W1g = W1_all[:sd], W1_all[sd:sd + ad], W1_all[sd + ad:]
    b1_all = jnp.transpose(b1, (1, 0, 2)).reshape(1, n_Q * H1).astype(jnp.float32)

    # Layers 2/3: block-diagonal across the ensemble (column order matches h1).
    W2_bd = jax.scipy.linalg.block_diag(
        *[W2[q] for q in range(n_Q)]).astype(compute_dtype)          # (n_Q*H1, n_Q*H2)
    b2_all = jnp.transpose(b2, (1, 0, 2)).reshape(1, n_Q * H2).astype(jnp.float32)
    W3_bd = jax.scipy.linalg.block_diag(
        *[W3[q] for q in range(n_Q)]).astype(compute_dtype)          # (n_Q*H2, n_Q)
    b3_all = jnp.transpose(b3, (1, 0, 2)).reshape(1, n_Q).astype(jnp.float32)

    # Batch tiling: weights stay resident (constant index_map); batch streams.
    B = state.shape[0]
    tm = min(B, block_batch)
    pad = (-B) % tm
    if pad:
        state = jnp.pad(state, ((0, pad), (0, 0)))
        action = jnp.pad(action, ((0, pad), (0, 0)))
        goal = jnp.pad(goal, ((0, pad), (0, 0)))
    Bp = B + pad
    grid = (Bp // tm,)

    def batch_spec(d):
        return pl.BlockSpec((tm, d), lambda i: (i, 0))

    def resident_spec(shape):
        return pl.BlockSpec(shape, lambda i: (0,) * len(shape))

    out = pl.pallas_call(
        ensemble_mlp_kernel,
        out_shape=jax.ShapeDtypeStruct((Bp, n_Q), jnp.float32),
        grid_spec=pltpu.PrefetchScalarGridSpec(
            num_scalar_prefetch=0,
            grid=grid,
            in_specs=[
                batch_spec(sd), batch_spec(ad), batch_spec(gd),
                resident_spec((sd, n_Q * H1)),
                resident_spec((ad, n_Q * H1)),
                resident_spec((gd, n_Q * H1)),
                resident_spec((1, n_Q * H1)),
                resident_spec((n_Q * H1, n_Q * H2)),
                resident_spec((1, n_Q * H2)),
                resident_spec((n_Q * H2, n_Q)),
                resident_spec((1, n_Q)),
            ],
            out_specs=pl.BlockSpec((tm, n_Q), lambda i: (i, 0)),
        ),
        compiler_params=pltpu.CompilerParams(
            dimension_semantics=("parallel",),
        ),
    )(state, action, goal, W1s, W1a, W1g, b1_all, W2_bd, b2_all, W3_bd, b3_all)

    return out[:B]


def init_params(key, state_dim, action_dim, hidden_dims, n_Q):
    """PyTorch-style nn.Linear init (U[-1/sqrt(fan_in), 1/sqrt(fan_in)]);
    weights stacked as (n_Q, in_features, out_features)."""
    assert len(hidden_dims) == 2, "kernel is specialized for two hidden layers"
    dims = [2 * state_dim + action_dim] + list(hidden_dims) + [1]
    params = []
    for li in range(len(dims) - 1):
        fan_in, fan_out = dims[li], dims[li + 1]
        bound = 1.0 / jnp.sqrt(float(fan_in))
        key, kw, kb = jax.random.split(key, 3)
        W = jax.random.uniform(kw, (n_Q, fan_in, fan_out), jnp.float32, -bound, bound)
        b = jax.random.uniform(kb, (n_Q, 1, fan_out), jnp.float32, -bound, bound)
        params += [W, b]
    return tuple(params)


def reference_forward(state, action, goal, params):
    x = jnp.concatenate([state, action, goal], axis=-1).astype(jnp.float32)
    W1, b1, W2, b2, W3, b3 = params
    qs = []
    for i in range(W1.shape[0]):
        h1 = jnp.maximum(x @ W1[i] + b1[i], 0.0)
        h2 = jnp.maximum(h1 @ W2[i] + b2[i], 0.0)
        qs.append(h2 @ W3[i] + b3[i])
    return jnp.concatenate(qs, axis=-1)


if __name__ == "__main__":
    # Small, forward-consistent shapes.
    batch = 8
    state_dim = 16
    action_dim = 8
    hidden_dims = [32, 32]
    n_Q = 2

    key = jax.random.PRNGKey(0)
    key, ks, ka, kg = jax.random.split(key, 4)
    state = jax.random.normal(ks, (batch, state_dim), jnp.float32)
    action = jax.random.normal(ka, (batch, action_dim), jnp.float32)
    goal = jax.random.normal(kg, (batch, state_dim), jnp.float32)

    params = init_params(key, state_dim, action_dim, hidden_dims, n_Q)

    fwd = jax.jit(functools.partial(ensemble_critic_forward))
    q = fwd(state, action, goal, params)
    q = jax.block_until_ready(q)

    q_ref = reference_forward(state, action, goal, params)
    assert q.shape == (batch, n_Q), q.shape
    assert jnp.allclose(q, q_ref, atol=1e-5, rtol=1e-5), "mismatch vs JAX reference"

    print("KERNEL_OK")
</pallas_src>

<mosaic_0001>
module attributes {stable_mosaic.version = 11 : i64} {
  func.func @ensemble_mlp_kernel(%arg0: i32, %arg1: memref<8x16xf32, #tpu.memory_space<vmem>>, %arg2: memref<8x8xf32, #tpu.memory_space<vmem>>, %arg3: memref<8x16xf32, #tpu.memory_space<vmem>>, %arg4: memref<16x64xf32, #tpu.memory_space<vmem>>, %arg5: memref<8x64xf32, #tpu.memory_space<vmem>>, %arg6: memref<16x64xf32, #tpu.memory_space<vmem>>, %arg7: memref<1x64xf32, #tpu.memory_space<vmem>>, %arg8: memref<64x64xf32, #tpu.memory_space<vmem>>, %arg9: memref<1x64xf32, #tpu.memory_space<vmem>>, %arg10: memref<64x2xf32, #tpu.memory_space<vmem>>, %arg11: memref<1x2xf32, #tpu.memory_space<vmem>>, %arg12: memref<8x2xf32, #tpu.memory_space<vmem>>) attributes {dimension_semantics = [#tpu.dimension_semantics<parallel>], iteration_bounds = array<i64: 1>, scalar_prefetch = 0 : i64, scratch_operands = 0 : i64, tpu.core_type = #tpu.core_type<tc>, window_params = [{transform_indices = @transform_0, window_bounds = array<i64: 8, 16>}, {transform_indices = @transform_1, window_bounds = array<i64: 8, 8>}, {transform_indices = @transform_2, window_bounds = array<i64: 8, 16>}, {pipeline_mode = #tpu.pipeline_mode<synchronous>, transform_indices = @transform_3, window_bounds = array<i64: 16, 64>}, {pipeline_mode = #tpu.pipeline_mode<synchronous>, transform_indices = @transform_4, window_bounds = array<i64: 8, 64>}, {pipeline_mode = #tpu.pipeline_mode<synchronous>, transform_indices = @transform_5, window_bounds = array<i64: 16, 64>}, {pipeline_mode = #tpu.pipeline_mode<synchronous>, transform_indices = @transform_6, window_bounds = array<i64: 1, 64>}, {pipeline_mode = #tpu.pipeline_mode<synchronous>, transform_indices = @transform_7, window_bounds = array<i64: 64, 64>}, {pipeline_mode = #tpu.pipeline_mode<synchronous>, transform_indices = @transform_8, window_bounds = array<i64: 1, 64>}, {pipeline_mode = #tpu.pipeline_mode<synchronous>, transform_indices = @transform_9, window_bounds = array<i64: 64, 2>}, {pipeline_mode = #tpu.pipeline_mode<synchronous>, transform_indices = @transform_10, window_bounds = array<i64: 1, 2>}, {transform_indices = @transform_11, window_bounds = array<i64: 8, 2>}]} {
    %c0 = arith.constant 0 : index
    %c0_0 = arith.constant 0 : index
    %0 = vector.load %arg1[%c0, %c0_0] : memref<8x16xf32, #tpu.memory_space<vmem>>, vector<8x16xf32>
    %c0_1 = arith.constant 0 : index
    %c0_2 = arith.constant 0 : index
    %1 = vector.load %arg4[%c0_1, %c0_2] : memref<16x64xf32, #tpu.memory_space<vmem>>, vector<16x64xf32>
    %cst = arith.constant dense<0.000000e+00> : vector<8x64xf32>
    %2 = tpu.matmul %0, %1, %cst {dimension_numbers = #tpu.dot_dimension_numbers<[1], [0], [0], [1], [0, 0, 1, 1], [], []>} : vector<8x16xf32>, vector<16x64xf32>, vector<8x64xf32> -> vector<8x64xf32>
    %c0_3 = arith.constant 0 : index
    %c0_4 = arith.constant 0 : index
    %3 = vector.load %arg2[%c0_3, %c0_4] : memref<8x8xf32, #tpu.memory_space<vmem>>, vector<8x8xf32>
    %c0_5 = arith.constant 0 : index
    %c0_6 = arith.constant 0 : index
    %4 = vector.load %arg5[%c0_5, %c0_6] : memref<8x64xf32, #tpu.memory_space<vmem>>, vector<8x64xf32>
    %cst_7 = arith.constant dense<0.000000e+00> : vector<8x64xf32>
    %5 = tpu.matmul %3, %4, %cst_7 {dimension_numbers = #tpu.dot_dimension_numbers<[1], [0], [0], [1], [0, 0, 1, 1], [], []>} : vector<8x8xf32>, vector<8x64xf32>, vector<8x64xf32> -> vector<8x64xf32>
    %6 = arith.addf %2, %5 : vector<8x64xf32>
    %c0_8 = arith.constant 0 : index
    %c0_9 = arith.constant 0 : index
    %7 = vector.load %arg3[%c0_8, %c0_9] : memref<8x16xf32, #tpu.memory_space<vmem>>, vector<8x16xf32>
    %c0_10 = arith.constant 0 : index
    %c0_11 = arith.constant 0 : index
    %8 = vector.load %arg6[%c0_10, %c0_11] : memref<16x64xf32, #tpu.memory_space<vmem>>, vector<16x64xf32>
    %cst_12 = arith.constant dense<0.000000e+00> : vector<8x64xf32>
    %9 = tpu.matmul %7, %8, %cst_12 {dimension_numbers = #tpu.dot_dimension_numbers<[1], [0], [0], [1], [0, 0, 1, 1], [], []>} : vector<8x16xf32>, vector<16x64xf32>, vector<8x64xf32> -> vector<8x64xf32>
    %10 = arith.addf %6, %9 : vector<8x64xf32>
    %c0_13 = arith.constant 0 : index
    %c0_14 = arith.constant 0 : index
    %11 = vector.load %arg7[%c0_13, %c0_14] : memref<1x64xf32, #tpu.memory_space<vmem>>, vector<1x64xf32>
    %12 = vector.broadcast %11 : vector<1x64xf32> to vector<8x64xf32>
    %13 = arith.addf %10, %12 : vector<8x64xf32>
    %cst_15 = arith.constant 0.000000e+00 : f32
    %14 = vector.broadcast %cst_15 : f32 to vector<8x64xf32>
    %15 = arith.maximumf %13, %14 : vector<8x64xf32>
    %c0_16 = arith.constant 0 : index
    %c0_17 = arith.constant 0 : index
    %16 = vector.load %arg8[%c0_16, %c0_17] : memref<64x64xf32, #tpu.memory_space<vmem>>, vector<64x64xf32>
    %cst_18 = arith.constant dense<0.000000e+00> : vector<8x64xf32>
    %17 = tpu.matmul %15, %16, %cst_18 {dimension_numbers = #tpu.dot_dimension_numbers<[1], [0], [0], [1], [0, 0, 1, 1], [], []>} : vector<8x64xf32>, vector<64x64xf32>, vector<8x64xf32> -> vector<8x64xf32>
    %c0_19 = arith.constant 0 : index
    %c0_20 = arith.constant 0 : index
    %18 = vector.load %arg9[%c0_19, %c0_20] : memref<1x64xf32, #tpu.memory_space<vmem>>, vector<1x64xf32>
    %19 = vector.broadcast %18 : vector<1x64xf32> to vector<8x64xf32>
    %20 = arith.addf %17, %19 : vector<8x64xf32>
    %cst_21 = arith.constant 0.000000e+00 : f32
    %21 = vector.broadcast %cst_21 : f32 to vector<8x64xf32>
    %22 = arith.maximumf %20, %21 : vector<8x64xf32>
    %c0_22 = arith.constant 0 : index
    %c0_23 = arith.constant 0 : index
    %23 = vector.load %arg10[%c0_22, %c0_23] : memref<64x2xf32, #tpu.memory_space<vmem>>, vector<64x2xf32>
    %cst_24 = arith.constant dense<0.000000e+00> : vector<8x2xf32>
    %24 = tpu.matmul %22, %23, %cst_24 {dimension_numbers = #tpu.dot_dimension_numbers<[1], [0], [0], [1], [0, 0, 1, 1], [], []>} : vector<8x64xf32>, vector<64x2xf32>, vector<8x2xf32> -> vector<8x2xf32>
    %c0_25 = arith.constant 0 : index
    %c0_26 = arith.constant 0 : index
    %25 = vector.load %arg11[%c0_25, %c0_26] : memref<1x2xf32, #tpu.memory_space<vmem>>, vector<1x2xf32>
    %26 = vector.broadcast %25 : vector<1x2xf32> to vector<8x2xf32>
    %27 = arith.addf %24, %26 : vector<8x2xf32>
    %c0_27 = arith.constant 0 : index
    %c0_28 = arith.constant 0 : index
    %28 = vector.load %arg12[%c0_27, %c0_28] : memref<8x2xf32, #tpu.memory_space<vmem>>, vector<8x2xf32>
    tpu.vector_store %arg12[%c0_27, %c0_28], %27 {strides = array<i32>} : memref<8x2xf32, #tpu.memory_space<vmem>>, vector<8x2xf32>,
    return
  }
  func.func @transform_0(%arg0: i32) -> (i32, i32) {
    %c0_i32 = arith.constant 0 : i32
    %c0_i32_0 = arith.constant 0 : i32
    return %arg0, %c0_i32 : i32, i32
  }
  func.func @transform_1(%arg0: i32) -> (i32, i32) {
    %c0_i32 = arith.constant 0 : i32
    %c0_i32_0 = arith.constant 0 : i32
    return %arg0, %c0_i32 : i32, i32
  }
  func.func @transform_2(%arg0: i32) -> (i32, i32) {
    %c0_i32 = arith.constant 0 : i32
    %c0_i32_0 = arith.constant 0 : i32
    return %arg0, %c0_i32 : i32, i32
  }
  func.func @transform_3(%arg0: i32) -> (i32, i32) {
    %c0_i32 = arith.constant 0 : i32
    %c0_i32_0 = arith.constant 0 : i32
    %c0_i32_1 = arith.constant 0 : i32
    return %c0_i32, %c0_i32_0 : i32, i32
  }
  func.func @transform_4(%arg0: i32) -> (i32, i32) {
    %c0_i32 = arith.constant 0 : i32
    %c0_i32_0 = arith.constant 0 : i32
    %c0_i32_1 = arith.constant 0 : i32
    return %c0_i32, %c0_i32_0 : i32, i32
  }
  func.func @transform_5(%arg0: i32) -> (i32, i32) {
    %c0_i32 = arith.constant 0 : i32
    %c0_i32_0 = arith.constant 0 : i32
    %c0_i32_1 = arith.constant 0 : i32
    return %c0_i32, %c0_i32_0 : i32, i32
  }
  func.func @transform_6(%arg0: i32) -> (i32, i32) {
    %c0_i32 = arith.constant 0 : i32
    %c0_i32_0 = arith.constant 0 : i32
    %c0_i32_1 = arith.constant 0 : i32
    return %c0_i32, %c0_i32_0 : i32, i32
  }
  func.func @transform_7(%arg0: i32) -> (i32, i32) {
    %c0_i32 = arith.constant 0 : i32
    %c0_i32_0 = arith.constant 0 : i32
    %c0_i32_1 = arith.constant 0 : i32
    return %c0_i32, %c0_i32_0 : i32, i32
  }
  func.func @transform_8(%arg0: i32) -> (i32, i32) {
    %c0_i32 = arith.constant 0 : i32
    %c0_i32_0 = arith.constant 0 : i32
    %c0_i32_1 = arith.constant 0 : i32
    return %c0_i32, %c0_i32_0 : i32, i32
  }
  func.func @transform_9(%arg0: i32) -> (i32, i32) {
    %c0_i32 = arith.constant 0 : i32
    %c0_i32_0 = arith.constant 0 : i32
    %c0_i32_1 = arith.constant 0 : i32
    return %c0_i32, %c0_i32_0 : i32, i32
  }
  func.func @transform_10(%arg0: i32) -> (i32, i32) {
    %c0_i32 = arith.constant 0 : i32
    %c0_i32_0 = arith.constant 0 : i32
    %c0_i32_1 = arith.constant 0 : i32
    return %c0_i32, %c0_i32_0 : i32, i32
  }
  func.func @transform_11(%arg0: i32) -> (i32, i32) {
    %c0_i32 = arith.constant 0 : i32
    %c0_i32_0 = arith.constant 0 : i32
    return %arg0, %c0_i32 : i32, i32
  }
}

</mosaic_0001>

<bundles_post_ra>
// kernel: ensemble_critic_forward.1
= control target key start
LH: loop header
LB: loop body
LE: loop exit
PB: predicated region body
PF: predicated region fallthrough
CT: control target
= control target key end

     0   :  { %vm43_vm0 = vcmask 64512   ;;  %vm67_vm1 = vcmask 130048   ;;  %vm136_vm2 = vcmask 523264   ;;  %vm196_vm3 = vcmask 15360   ;;  %s354_s4 = inlined_call_operand.vmem [shape: f32[8,64], index: 4, kind: input, shape index: {}]   ;;  %s355_s1 = inlined_call_operand.vmem [shape: f32[8,8], index: 1, kind: input, shape index: {}]   ;;  %s356_s3 = inlined_call_operand.vmem [shape: f32[16,64], index: 3, kind: input, shape index: {}]   ;;  %s357_s5 = inlined_call_operand.vmem [shape: f32[16,64], index: 5, kind: input, shape index: {}]   ;;  %s358_s2 = inlined_call_operand.vmem [shape: f32[8,16], index: 2, kind: input, shape index: {}]   ;;  %s359_s0 = inlined_call_operand.vmem [shape: f32[8,16], index: 0, kind: input, shape index: {}]   ;;  %s360_s6 = inlined_call_operand.vmem [shape: f32[1,64], index: 6, kind: input, shape index: {}]   ;;  %s361_s8 = inlined_call_operand.vmem [shape: f32[1,64], index: 8, kind: input, shape index: {}]   ;;  %s362_s7 = inlined_call_operand.vmem [shape: f32[64,64], index: 7, kind: input, shape index: {}]   ;;  %s363_s9 = inlined_call_operand.vmem [shape: f32[64,2], index: 9, kind: input, shape index: {}]   ;;  %s364_s10 = inlined_call_operand.vmem [shape: f32[1,2], index: 10, kind: input, shape index: {}]   ;;  %s365_s11 = inlined_call_operand.vmem [shape: f32[8,2], index: 11, kind: output, shape index: {}]  }
   0x1   :  { %v42_v0 = vld [vmem:[%s354_s4] sm:$0xff]  ;;  %v40_v2 = vld [vmem:[%s356_s3 + $0x8] sm:$0xff]  ;;  %v131_v8 = vld [vmem:[%s362_s7 + $0x38] sm:$0xff] }
   0x2   :  { %v41_v1 = vld [vmem:[%s355_s1] sm:$0xff]  ;;  %62 = vmatpush.msra.mxu1 %v42_v0  ;;  %v93_v3 = vld [vmem:[%s357_s5 + $0x8] sm:$0xff]  ;;  %v130_v9 = vld [vmem:[%s362_s7 + $0x30] sm:$0xff]  ;;  %148 = vmatpush.msra.mxu3 %v131_v8 }
   0x3   :  { %v92_v4 = vld [vmem:[%s357_s5] sm:$0xff]  ;;  %202 = vmatmul.msk.f32.vlgmr.msra.gmra.mxu1 %vm43_vm0, %v41_v1  ;;  %111 = vmatpush.msra.mxu2 %v93_v3  ;;  %v129_v10 = vld [vmem:[%s362_s7 + $0x28] sm:$0xff]  ;;  %v127_v12 = vld [vmem:[%s362_s7 + $0x18] sm:$0xff] }
   0x4   :  { %v39_v5 = vld [vmem:[%s356_s3] sm:$0xff]  ;;  %85 = vmatpush.msrb.mxu1 %v40_v2  ;;  %149 = vmatpush.msra.mxu3 %v130_v9  ;;  %v126_v13 = vld [vmem:[%s362_s7 + $0x10] sm:$0xff]  ;;  %v125_v14 = vld [vmem:[%s362_s7 + $0x8] sm:$0xff] }
   0x5   :  { %v91_v6 = vld [vmem:[%s358_s2] sm:$0xff]  ;;  %112 = vmatpush.msra.mxu2 %v92_v4  ;;  %v168_v16 = vld [vmem:[%s363_s9 + $0x38] sm:$0xff]  ;;  %v167_v17 = vld [vmem:[%s363_s9 + $0x30] sm:$0xff] }
   0x6   :  { %86 = vmatpush.msrb.mxu1 %v39_v5  ;;  %204 = vmatmul.msk.f32.vlgmr.msra.gmra.mxu2 %vm67_vm1, %v91_v6  ;;  %v38_v7 = vld [vmem:[%s359_s0] sm:$0xff]  ;;  %v166_v18 = vld [vmem:[%s363_s9 + $0x28] sm:$0xff]  ;;  %v164_v20 = vld [vmem:[%s363_s9 + $0x18] sm:$0xff] }
   0x7   :  { %150 = vmatpush.msra.mxu3 %v129_v10  ;;  %v128_v11 = vld [vmem:[%s362_s7 + $0x20] sm:$0xff]  ;;  %184 = vmatpush.msra.mxu0 %v168_v16  ;;  %v163_v29 = vld [vmem:[%s363_s9 + $0x10] sm:$0xff]  ;;  %v162_v30 = vld [vmem:[%s363_s9 + $0x8] sm:$0xff] }
   0x8   :  { %v124_v15 = vld [vmem:[%s362_s7] sm:$0xff] }
   0x9   :  { %151 = vmatpush.msra.mxu3 %v128_v11  ;;  %185 = vmatpush.msra.mxu0 %v167_v17  ;;  %v165_v19 = vld [vmem:[%s363_s9 + $0x20] sm:$0xff] }
   0xa   :  { %v207_v25 = vld [vmem:[%s360_s6] ss:$0 sm:$0xff] }
   0xb   :  { %203 = vmatmul.msk.f32.vlgmr.msrb.gmra.mxu1 %vm67_vm1, %v38_v7  ;;  %152 = vmatpush.msra.mxu3 %v127_v12  ;;  %v161_v31 = vld [vmem:[%s363_s9] sm:$0xff] }
   0xc   :  { %186 = vmatpush.msra.mxu0 %v166_v18  ;;  %v208_v32 = vld [vmem:[%s361_s8] ss:$0 sm:$0xff] }
   0xd   :  { %153 = vmatpush.msra.mxu3 %v126_v13  ;;  %v209_v36 = vld [vmem:[%s364_s10] ss:$0 sm:$0xff] }
   0xe   :  { %187 = vmatpush.msra.mxu0 %v165_v19 }
   0xf   :  { %154 = vmatpush.msra.mxu3 %v125_v14 }
  0x10   :  { %188 = vmatpush.msra.mxu0 %v164_v20 }
  0x11   :  { %155 = vmatpush.msra.mxu3 %v124_v15 }
  0x12   :  { %189 = vmatpush.msra.mxu0 %v163_v29 }
  0x14   :  { %190 = vmatpush.msra.mxu0 %v162_v30 }
  0x16   :  { %191 = vmatpush.msra.mxu0 %v161_v31 }
  0x80   :  { %v64_v21 = vpop.f32.mrf.mxu1 }
  0x88   :  { %v88_v22 = vpop.f32.mrf.mxu1 }
  0x89   :  { %v89_v23 = vadd.f32 %v88_v22, %v64_v21  ;;  %v114_v24 = vpop.f32.mrf.mxu2 }
  0x8b   :  { %v117_v26 = vadd.f32 %v114_v24, %v89_v23 }
  0x8d   :  { %v122_v27 = vadd.f32 %v207_v25, %v117_v26 }
  0x8f   :  { %v123_v28 = vmax.f32 %v122_v27, 0.0 }
  0x91   :  { %205 = vmatmul.msk.f32.vlgmr.msra.gmra.mxu3 %vm136_vm2, %v123_v28 }
 0x114   :  { %v157_v33 = vpop.f32.mrf.mxu3 }
 0x115   :  { %v158_v34 = vadd.f32 %v208_v32, %v157_v33 }
 0x117   :  { %v160_v35 = vmax.f32 %v158_v34, 0.0 }
 0x119   :  { %206 = vmatmul.msk.f32.vlgmr.msra.gmra.mxu0 %vm136_vm2, %v160_v35 }
 0x196   :  { %v193_v37 = vpop.f32.mrf.mxu0 }
 0x197   :  { %v194_v38 = vadd.f32 %v209_v36, %v193_v37 }
 0x199   :  { %197 = vst.msk [vmem:[%s365_s11] sm:$0xff] %vm196_vm3, %v194_v38 }

</bundles_post_ra>
